<compile_context>
chip_gen: v7x
topology: tpu7x:2x2x1
jax: 0.10.0
libtpu: 0.0.40
codegen_flags: <defaults>
</compile_context>

<pallas_src>
import jax
import jax.numpy as jnp
import numpy as np
from jax.experimental import pallas as pl
from jax.experimental.pallas import tpu as pltpu

# TODO(synk): replace with the real consts.* values if known.
MLP_LEAKY_SLOPE = 0.2            # consts.MLP_LEAKY_SLOPE (SharedMLP activation)
HIDDEN_LAYER_LEAKY_SLOPE = 0.01  # consts.HIDDEN_LAYER_LEAKY_SLOPE
HIDDEN_LAYER_D = 128             # consts.HIDDEN_LAYER_D
NUM_DECODED_POINTS = 128         # consts.NUM_DECODED_POINTS


def _leaky(y, slope):
    return jnp.where(y >= 0, y, slope * y)


# ----------------------------------------------------------------------------
# Fused Decoder kernel: one row-tile of points through all four layers.
# Intermediates are cast back to the operand dtype so every jnp.dot is a
# homogeneous (e.g. bf16 x bf16 -> f32-acc) MXU matmul.
# ----------------------------------------------------------------------------
def decoder_kernel(x_ref, w1_ref, b1_ref, w2_ref, b2_ref, w3_ref, b3_ref,
                   w4_ref, b4_ref, o_ref):
    cdt = x_ref.dtype
    x = x_ref[...]
    h = _leaky(jnp.dot(x, w1_ref[...], preferred_element_type=jnp.float32)
               + b1_ref[...], MLP_LEAKY_SLOPE).astype(cdt)
    h = _leaky(jnp.dot(h, w2_ref[...], preferred_element_type=jnp.float32)
               + b2_ref[...], HIDDEN_LAYER_LEAKY_SLOPE).astype(cdt)
    h = _leaky(jnp.dot(h, w3_ref[...], preferred_element_type=jnp.float32)
               + b3_ref[...], HIDDEN_LAYER_LEAKY_SLOPE).astype(cdt)
    y = jnp.dot(h, w4_ref[...], preferred_element_type=jnp.float32) + b4_ref[...]
    o_ref[...] = y.astype(o_ref.dtype)


def _round_up(x, m):
    return (x + m - 1) // m * m


def decoder_forward(params, point_features, *, tile_n=1024,
                    compute_dtype=jnp.bfloat16, out_dtype=None):
    """Pallas Decoder forward: [N, d] -> [N, NUM_DECODED_POINTS, 3]."""
    N, d = point_features.shape
    H = params["w1"].shape[1]
    Dout = params["w4"].shape[1]          # NUM_DECODED_POINTS * 3 (lane-dense, 3*128)
    if out_dtype is None:
        out_dtype = compute_dtype

    # bf16 packs 16 rows per sublane tile; f32 packs 8.
    granule = 16 if compute_dtype == jnp.bfloat16 else 8

    x = point_features.astype(compute_dtype)
    w = {k: v.astype(compute_dtype) for k, v in params.items()}

    # Row-tile sizing: biggest tile that covers N, capped at tile_n.  For
    # larger problems keep >= 2 grid steps (v7x has 2 TensorCores) without
    # dropping below 256 rows per MXU issue (v6e/v7x 256x256 MXU fill).
    tn = min(tile_n, _round_up(N, granule))
    if N >= 512:
        tn = min(tn, max(256, _round_up(pl.cdiv(N, 2), granule)))
    grid = (pl.cdiv(N, tn),)   # partial edge block handled by Pallas; no padding copy

    full = lambda i: (0, 0)   # weights/biases: resident across grid steps
    row = lambda i: (i, 0)    # x / output: tiled over rows

    cdt_bytes = jnp.dtype(compute_dtype).itemsize
    out_bytes = jnp.dtype(out_dtype).itemsize
    weight_elems = d * H + 2 * H * H + H * Dout + 3 * H + Dout
    cost = pl.CostEstimate(
        flops=2 * N * (d * H + 2 * H * H + H * Dout),
        transcendentals=0,
        bytes_accessed=N * d * cdt_bytes + N * Dout * out_bytes
        + weight_elems * cdt_bytes,
    )

    out = pl.pallas_call(
        decoder_kernel,
        out_shape=jax.ShapeDtypeStruct((N, Dout), out_dtype),
        grid=grid,
        in_specs=[
            pl.BlockSpec((tn, d), row),
            pl.BlockSpec((d, H), full), pl.BlockSpec((1, H), full),
            pl.BlockSpec((H, H), full), pl.BlockSpec((1, H), full),
            pl.BlockSpec((H, H), full), pl.BlockSpec((1, H), full),
            pl.BlockSpec((H, Dout), full), pl.BlockSpec((1, Dout), full),
        ],
        out_specs=pl.BlockSpec((tn, Dout), row),
        compiler_params=pltpu.CompilerParams(
            dimension_semantics=("parallel",),
            vmem_limit_bytes=32 * 1024 * 1024),
        cost_estimate=cost,
    )(x, w["w1"], w["b1"], w["w2"], w["b2"],
      w["w3"], w["b3"], w["w4"], w["b4"])

    return out.reshape(N, Dout // 3, 3)


# ----------------------------------------------------------------------------
# Pure-JAX reference + parameter init.
# ----------------------------------------------------------------------------
def decoder_reference(params, point_features):
    x = _leaky(point_features @ params["w1"] + params["b1"], MLP_LEAKY_SLOPE)
    x = _leaky(x @ params["w2"] + params["b2"], HIDDEN_LAYER_LEAKY_SLOPE)
    x = _leaky(x @ params["w3"] + params["b3"], HIDDEN_LAYER_LEAKY_SLOPE)
    y = x @ params["w4"] + params["b4"]
    return y.reshape(point_features.shape[0], NUM_DECODED_POINTS, 3)


def init_params(key, d):
    ks = jax.random.split(key, 8)

    def lin(kw, kb, din, dout):
        w = jax.random.normal(kw, (din, dout), jnp.float32) * (1.0 / np.sqrt(din))
        b = jax.random.normal(kb, (1, dout), jnp.float32) * 0.01
        return w, b

    H = HIDDEN_LAYER_D
    Dout = NUM_DECODED_POINTS * 3
    p = {}
    p["w1"], p["b1"] = lin(ks[0], ks[1], d, H)      # input_layer (SharedMLP)
    p["w2"], p["b2"] = lin(ks[2], ks[3], H, H)      # hidden_1
    p["w3"], p["b3"] = lin(ks[4], ks[5], H, H)      # hidden_2
    p["w4"], p["b4"] = lin(ks[6], ks[7], H, Dout)   # output_layer (no activation)
    return p


if __name__ == "__main__":
    d = 32        # input point-feature dim
    N = 64        # number of points (rows)

    key = jax.random.PRNGKey(0)
    k_x, k_p = jax.random.split(key)

    point_features = jax.random.normal(k_x, (N, d), jnp.float32)
    params = init_params(k_p, d)
    ref = decoder_reference(params, point_features)

    # Fast default path: bf16 operands (f32 accumulation), bf16 output.
    out_bf16 = jax.block_until_ready(decoder_forward(params, point_features))
    assert out_bf16.shape == (N, NUM_DECODED_POINTS, 3)
    assert out_bf16.dtype == jnp.bfloat16
    np.testing.assert_allclose(np.asarray(out_bf16.astype(jnp.float32)),
                               np.asarray(ref), rtol=8e-2, atol=8e-2)

    # Exact path: f32 operands / f32 output.
    out_f32 = jax.block_until_ready(
        decoder_forward(params, point_features,
                        compute_dtype=jnp.float32, out_dtype=jnp.float32))
    np.testing.assert_allclose(np.asarray(out_f32), np.asarray(ref),
                               rtol=1e-2, atol=1e-2)

    # Ragged N (not a multiple of the tile granule): exercises the partial
    # edge block now that the wrapper-side padding copy has been removed.
    N2 = 100
    pf2 = jax.random.normal(jax.random.PRNGKey(1), (N2, d), jnp.float32)
    out2 = jax.block_until_ready(decoder_forward(params, pf2))
    assert out2.shape == (N2, NUM_DECODED_POINTS, 3)
    np.testing.assert_allclose(np.asarray(out2.astype(jnp.float32)),
                               np.asarray(decoder_reference(params, pf2)),
                               rtol=8e-2, atol=8e-2)

    print("KERNEL_OK")
</pallas_src>

<mosaic_0001>
module attributes {stable_mosaic.version = 11 : i64} {
  func.func @decoder_kernel(%arg0: i32, %arg1: memref<64x32xbf16, #tpu.memory_space<vmem>>, %arg2: memref<32x128xbf16, #tpu.memory_space<vmem>>, %arg3: memref<1x128xbf16, #tpu.memory_space<vmem>>, %arg4: memref<128x128xbf16, #tpu.memory_space<vmem>>, %arg5: memref<1x128xbf16, #tpu.memory_space<vmem>>, %arg6: memref<128x128xbf16, #tpu.memory_space<vmem>>, %arg7: memref<1x128xbf16, #tpu.memory_space<vmem>>, %arg8: memref<128x384xbf16, #tpu.memory_space<vmem>>, %arg9: memref<1x384xbf16, #tpu.memory_space<vmem>>, %arg10: memref<64x384xbf16, #tpu.memory_space<vmem>>) attributes {dimension_semantics = [#tpu.dimension_semantics<parallel>], iteration_bounds = array<i64: 1>, scalar_prefetch = 0 : i64, scratch_operands = 0 : i64, tpu.core_type = #tpu.core_type<tc>, window_params = [{transform_indices = @transform_0, window_bounds = array<i64: 64, 32>}, {pipeline_mode = #tpu.pipeline_mode<synchronous>, transform_indices = @transform_1, window_bounds = array<i64: 32, 128>}, {pipeline_mode = #tpu.pipeline_mode<synchronous>, transform_indices = @transform_2, window_bounds = array<i64: 1, 128>}, {pipeline_mode = #tpu.pipeline_mode<synchronous>, transform_indices = @transform_3, window_bounds = array<i64: 128, 128>}, {pipeline_mode = #tpu.pipeline_mode<synchronous>, transform_indices = @transform_4, window_bounds = array<i64: 1, 128>}, {pipeline_mode = #tpu.pipeline_mode<synchronous>, transform_indices = @transform_5, window_bounds = array<i64: 128, 128>}, {pipeline_mode = #tpu.pipeline_mode<synchronous>, transform_indices = @transform_6, window_bounds = array<i64: 1, 128>}, {pipeline_mode = #tpu.pipeline_mode<synchronous>, transform_indices = @transform_7, window_bounds = array<i64: 128, 384>}, {pipeline_mode = #tpu.pipeline_mode<synchronous>, transform_indices = @transform_8, window_bounds = array<i64: 1, 384>}, {transform_indices = @transform_9, window_bounds = array<i64: 64, 384>}]} {
    %c0 = arith.constant 0 : index
    %c0_0 = arith.constant 0 : index
    %0 = vector.load %arg1[%c0, %c0_0] : memref<64x32xbf16, #tpu.memory_space<vmem>>, vector<64x32xbf16>
    %c0_1 = arith.constant 0 : index
    %c0_2 = arith.constant 0 : index
    %1 = vector.load %arg2[%c0_1, %c0_2] : memref<32x128xbf16, #tpu.memory_space<vmem>>, vector<32x128xbf16>
    %cst = arith.constant dense<0.000000e+00> : vector<64x128xf32>
    %2 = tpu.matmul %0, %1, %cst {dimension_numbers = #tpu.dot_dimension_numbers<[1], [0], [0], [1], [0, 0, 1, 1], [], []>} : vector<64x32xbf16>, vector<32x128xbf16>, vector<64x128xf32> -> vector<64x128xf32>
    %c0_3 = arith.constant 0 : index
    %c0_4 = arith.constant 0 : index
    %3 = vector.load %arg3[%c0_3, %c0_4] : memref<1x128xbf16, #tpu.memory_space<vmem>>, vector<1x128xbf16>
    %4 = arith.extf %3 : vector<1x128xbf16> to vector<1x128xf32>
    %5 = vector.broadcast %4 : vector<1x128xf32> to vector<64x128xf32>
    %6 = arith.addf %2, %5 : vector<64x128xf32>
    %cst_5 = arith.constant 0.000000e+00 : f32
    %7 = vector.broadcast %cst_5 : f32 to vector<64x128xf32>
    %8 = arith.cmpf oge, %6, %7 : vector<64x128xf32>
    %cst_6 = arith.constant 2.000000e-01 : f32
    %9 = vector.broadcast %cst_6 : f32 to vector<64x128xf32>
    %10 = arith.mulf %9, %6 : vector<64x128xf32>
    %11 = arith.select %8, %6, %10 : vector<64x128xi1>, vector<64x128xf32>
    %12 = arith.truncf %11 : vector<64x128xf32> to vector<64x128xbf16>
    %c0_7 = arith.constant 0 : index
    %c0_8 = arith.constant 0 : index
    %13 = vector.load %arg4[%c0_7, %c0_8] : memref<128x128xbf16, #tpu.memory_space<vmem>>, vector<128x128xbf16>
    %cst_9 = arith.constant dense<0.000000e+00> : vector<64x128xf32>
    %14 = tpu.matmul %12, %13, %cst_9 {dimension_numbers = #tpu.dot_dimension_numbers<[1], [0], [0], [1], [0, 0, 1, 1], [], []>} : vector<64x128xbf16>, vector<128x128xbf16>, vector<64x128xf32> -> vector<64x128xf32>
    %c0_10 = arith.constant 0 : index
    %c0_11 = arith.constant 0 : index
    %15 = vector.load %arg5[%c0_10, %c0_11] : memref<1x128xbf16, #tpu.memory_space<vmem>>, vector<1x128xbf16>
    %16 = arith.extf %15 : vector<1x128xbf16> to vector<1x128xf32>
    %17 = vector.broadcast %16 : vector<1x128xf32> to vector<64x128xf32>
    %18 = arith.addf %14, %17 : vector<64x128xf32>
    %cst_12 = arith.constant 0.000000e+00 : f32
    %19 = vector.broadcast %cst_12 : f32 to vector<64x128xf32>
    %20 = arith.cmpf oge, %18, %19 : vector<64x128xf32>
    %cst_13 = arith.constant 0.00999999977 : f32
    %21 = vector.broadcast %cst_13 : f32 to vector<64x128xf32>
    %22 = arith.mulf %21, %18 : vector<64x128xf32>
    %23 = arith.select %20, %18, %22 : vector<64x128xi1>, vector<64x128xf32>
    %24 = arith.truncf %23 : vector<64x128xf32> to vector<64x128xbf16>
    %c0_14 = arith.constant 0 : index
    %c0_15 = arith.constant 0 : index
    %25 = vector.load %arg6[%c0_14, %c0_15] : memref<128x128xbf16, #tpu.memory_space<vmem>>, vector<128x128xbf16>
    %cst_16 = arith.constant dense<0.000000e+00> : vector<64x128xf32>
    %26 = tpu.matmul %24, %25, %cst_16 {dimension_numbers = #tpu.dot_dimension_numbers<[1], [0], [0], [1], [0, 0, 1, 1], [], []>} : vector<64x128xbf16>, vector<128x128xbf16>, vector<64x128xf32> -> vector<64x128xf32>
    %c0_17 = arith.constant 0 : index
    %c0_18 = arith.constant 0 : index
    %27 = vector.load %arg7[%c0_17, %c0_18] : memref<1x128xbf16, #tpu.memory_space<vmem>>, vector<1x128xbf16>
    %28 = arith.extf %27 : vector<1x128xbf16> to vector<1x128xf32>
    %29 = vector.broadcast %28 : vector<1x128xf32> to vector<64x128xf32>
    %30 = arith.addf %26, %29 : vector<64x128xf32>
    %cst_19 = arith.constant 0.000000e+00 : f32
    %31 = vector.broadcast %cst_19 : f32 to vector<64x128xf32>
    %32 = arith.cmpf oge, %30, %31 : vector<64x128xf32>
    %cst_20 = arith.constant 0.00999999977 : f32
    %33 = vector.broadcast %cst_20 : f32 to vector<64x128xf32>
    %34 = arith.mulf %33, %30 : vector<64x128xf32>
    %35 = arith.select %32, %30, %34 : vector<64x128xi1>, vector<64x128xf32>
    %36 = arith.truncf %35 : vector<64x128xf32> to vector<64x128xbf16>
    %c0_21 = arith.constant 0 : index
    %c0_22 = arith.constant 0 : index
    %37 = vector.load %arg8[%c0_21, %c0_22] : memref<128x384xbf16, #tpu.memory_space<vmem>>, vector<128x384xbf16>
    %cst_23 = arith.constant dense<0.000000e+00> : vector<64x384xf32>
    %38 = tpu.matmul %36, %37, %cst_23 {dimension_numbers = #tpu.dot_dimension_numbers<[1], [0], [0], [1], [0, 0, 1, 1], [], []>} : vector<64x128xbf16>, vector<128x384xbf16>, vector<64x384xf32> -> vector<64x384xf32>
    %c0_24 = arith.constant 0 : index
    %c0_25 = arith.constant 0 : index
    %39 = vector.load %arg9[%c0_24, %c0_25] : memref<1x384xbf16, #tpu.memory_space<vmem>>, vector<1x384xbf16>
    %40 = arith.extf %39 : vector<1x384xbf16> to vector<1x384xf32>
    %41 = vector.broadcast %40 : vector<1x384xf32> to vector<64x384xf32>
    %42 = arith.addf %38, %41 : vector<64x384xf32>
    %43 = arith.truncf %42 : vector<64x384xf32> to vector<64x384xbf16>
    %c0_26 = arith.constant 0 : index
    %c0_27 = arith.constant 0 : index
    %44 = vector.load %arg10[%c0_26, %c0_27] : memref<64x384xbf16, #tpu.memory_space<vmem>>, vector<64x384xbf16>
    tpu.vector_store %arg10[%c0_26, %c0_27], %43 {strides = array<i32>} : memref<64x384xbf16, #tpu.memory_space<vmem>>, vector<64x384xbf16>,
    return
  }
  func.func @transform_0(%arg0: i32) -> (i32, i32) {
    %c0_i32 = arith.constant 0 : i32
    %c0_i32_0 = arith.constant 0 : i32
    return %arg0, %c0_i32 : i32, i32
  }
  func.func @transform_1(%arg0: i32) -> (i32, i32) {
    %c0_i32 = arith.constant 0 : i32
    %c0_i32_0 = arith.constant 0 : i32
    %c0_i32_1 = arith.constant 0 : i32
    return %c0_i32, %c0_i32_0 : i32, i32
  }
  func.func @transform_2(%arg0: i32) -> (i32, i32) {
    %c0_i32 = arith.constant 0 : i32
    %c0_i32_0 = arith.constant 0 : i32
    %c0_i32_1 = arith.constant 0 : i32
    return %c0_i32, %c0_i32_0 : i32, i32
  }
  func.func @transform_3(%arg0: i32) -> (i32, i32) {
    %c0_i32 = arith.constant 0 : i32
    %c0_i32_0 = arith.constant 0 : i32
    %c0_i32_1 = arith.constant 0 : i32
    return %c0_i32, %c0_i32_0 : i32, i32
  }
  func.func @transform_4(%arg0: i32) -> (i32, i32) {
    %c0_i32 = arith.constant 0 : i32
    %c0_i32_0 = arith.constant 0 : i32
    %c0_i32_1 = arith.constant 0 : i32
    return %c0_i32, %c0_i32_0 : i32, i32
  }
  func.func @transform_5(%arg0: i32) -> (i32, i32) {
    %c0_i32 = arith.constant 0 : i32
    %c0_i32_0 = arith.constant 0 : i32
    %c0_i32_1 = arith.constant 0 : i32
    return %c0_i32, %c0_i32_0 : i32, i32
  }
  func.func @transform_6(%arg0: i32) -> (i32, i32) {
    %c0_i32 = arith.constant 0 : i32
    %c0_i32_0 = arith.constant 0 : i32
    %c0_i32_1 = arith.constant 0 : i32
    return %c0_i32, %c0_i32_0 : i32, i32
  }
  func.func @transform_7(%arg0: i32) -> (i32, i32) {
    %c0_i32 = arith.constant 0 : i32
    %c0_i32_0 = arith.constant 0 : i32
    %c0_i32_1 = arith.constant 0 : i32
    return %c0_i32, %c0_i32_0 : i32, i32
  }
  func.func @transform_8(%arg0: i32) -> (i32, i32) {
    %c0_i32 = arith.constant 0 : i32
    %c0_i32_0 = arith.constant 0 : i32
    %c0_i32_1 = arith.constant 0 : i32
    return %c0_i32, %c0_i32_0 : i32, i32
  }
  func.func @transform_9(%arg0: i32) -> (i32, i32) {
    %c0_i32 = arith.constant 0 : i32
    %c0_i32_0 = arith.constant 0 : i32
    return %arg0, %c0_i32 : i32, i32
  }
}

</mosaic_0001>

<bundles_post_ra>
// kernel: tpu_custom_call.1
= control target key start
LH: loop header
LB: loop body
LE: loop exit
PB: predicated region body
PF: predicated region fallthrough
CT: control target
= control target key end

     0   :  { %14 = vsyncpa [#allocation3], 0  ;;  %s1574_s0 = inlined_call_operand.vmem [shape: bf16[64,32], index: 0, kind: input, shape index: {}]   ;;  %s1575_s1 = inlined_call_operand.hbm [shape: bf16[32,128], index: 1, kind: input, shape index: {}]   ;;  %s1576_s2 = inlined_call_operand.vmem [shape: bf16[1,128], index: 2, kind: input, shape index: {}]   ;;  %s1577_s3 = inlined_call_operand.hbm [shape: bf16[128,128], index: 3, kind: input, shape index: {}]   ;;  %s1578_s4 = inlined_call_operand.vmem [shape: bf16[1,128], index: 4, kind: input, shape index: {}]   ;;  %s1579_s5 = inlined_call_operand.vmem [shape: bf16[128,128], index: 5, kind: input, shape index: {}]   ;;  %s1580_s6 = inlined_call_operand.vmem [shape: bf16[1,128], index: 6, kind: input, shape index: {}]   ;;  %s1581_s7 = inlined_call_operand.hbm [shape: bf16[128,384], index: 7, kind: input, shape index: {}]   ;;  %s1582_s8 = inlined_call_operand.vmem [shape: bf16[1,384], index: 8, kind: input, shape index: {}]   ;;  %s1583_s9 = inlined_call_operand.hbm [shape: bf16[64,384], index: 9, kind: output, shape index: {}]  }
   0x1   :  { %15 = vsyncpa [#allocation6], 0 }
   0x2   :  { %16 = vsyncpa [#allocation4], 0  ;;  %s1364_s30 = smov [#allocation5]   ;;  %s1365_s11 = smov [#allocation2]  }
   0x3   :  { %s38_s10 = sshll.u32 %s1364_s30, 4  ;;  %s24_s12 = sshll.u32 %s1365_s11, 4  ;;  %s39_s10 = int_to_ptr.vmem [resolvable:$true] %s38_s10  ;;  %s1423_s12 = int_to_ptr.vmem [resolvable:$true] %s24_s12 }
   0x4   :  { %s1270_s15 = scalar_lea.hbm %s1577_s3, 1024 }
   0x5   :  { %p1271_p0 = scmp.ne.s32.totalorder %s1577_s3, %s1270_s15  ;;  %p1274_p1 = scmp.lt.u32.totalorder %s1270_s15, %s1577_s3 }
   0x7   :  { %p1276_p2 = pnand %p1274_p1, %p1271_p0 }
   0x9   :  { %1279 = shalt.err (!%p1276_p2)
}
   0xa   :  { %s1280_s20 = scalar_lea.vmem %s39_s10, 1024  ;;  %p1285_p4 = scmp.lt.s32.totalorder %s39_s10, %s39_s10 }
   0xb   :  { %p1281_p3 = scmp.ne.s32.totalorder %s39_s10, %s1280_s20  ;;  %p1286_p5 = scmp.lt.s32.totalorder %s1280_s20, %s1280_s20 }
   0xd   :  { %p1287_p6 = por %p1286_p5, %p1285_p4 }
   0xf   :  { %p1288_p7 = pnand %p1287_p6, %p1281_p3 }
  0x11   :  { %1291 = shalt.err (!%p1288_p7)
}
  0x12   :  { %s1366_s21 = smov 64   ;;  %s1367_s22 = smov 4  }
  0x13   :  { %44 = dma.hbm_to_vmem [thread:$0]  %s1577_s3, 1024, %s39_s10, [#allocation6], %s1366_s21, %s1366_s21, %s1367_s22  }
  0x14   :  { %s1292_s27 = scalar_lea.hbm %s1575_s1, 256 }
  0x15   :  { %p1293_p8 = scmp.ne.s32.totalorder %s1575_s1, %s1292_s27  ;;  %p1296_p9 = scmp.lt.u32.totalorder %s1292_s27, %s1575_s1 }
  0x17   :  { %p1298_p10 = pnand %p1296_p9, %p1293_p8 }
  0x19   :  { %1301 = shalt.err (!%p1298_p10)
}
  0x1a   :  { %s1302_s13 = scalar_lea.vmem %s1423_s12, 256  ;;  %p1307_p12 = scmp.lt.s32.totalorder %s1423_s12, %s1423_s12 }
  0x1b   :  { %p1303_p11 = scmp.ne.s32.totalorder %s1423_s12, %s1302_s13  ;;  %p1308_p13 = scmp.lt.s32.totalorder %s1302_s13, %s1302_s13 }
  0x1d   :  { %p1309_p0 = por %p1308_p13, %p1307_p12 }
  0x1f   :  { %p1310_p1 = pnand %p1309_p0, %p1303_p11 }
  0x21   :  { %1313 = shalt.err (!%p1310_p1)
}
  0x22   :  { %30 = dma.hbm_to_vmem [thread:$0]  %s1575_s1, 256, %s1423_s12, [#allocation3], %s1366_s21, %s1366_s21, %s1367_s22  }
  0x23   :  { %s1368_s14 = smov [#allocation7]   ;;  %s1314_s18 = scalar_lea.hbm %s1581_s7, 3072 }
  0x24   :  { %s56_s15 = sshll.u32 %s1368_s14, 4  ;;  %p1315_p2 = scmp.ne.s32.totalorder %s1581_s7, %s1314_s18  ;;  %s57_s15 = int_to_ptr.vmem [resolvable:$true] %s56_s15 }
  0x25   :  { %p1318_p3 = scmp.lt.u32.totalorder %s1314_s18, %s1581_s7 }
  0x27   :  { %p1320_p4 = pnand %p1318_p3, %p1315_p2 }
  0x29   :  { %1323 = shalt.err (!%p1320_p4)
}
  0x2a   :  { %s1324_s25 = scalar_lea.vmem %s57_s15, 3072  ;;  %p1329_p6 = scmp.lt.s32.totalorder %s57_s15, %s57_s15 }
  0x2b   :  { %p1325_p5 = scmp.ne.s32.totalorder %s57_s15, %s1324_s25  ;;  %p1330_p7 = scmp.lt.s32.totalorder %s1324_s25, %s1324_s25 }
  0x2d   :  { %p1331_p8 = por %p1330_p7, %p1329_p6 }
  0x2f   :  { %p1332_p9 = pnand %p1331_p8, %p1325_p5 }
  0x31   :  { %1335 = shalt.err (!%p1332_p9)
}
  0x32   :  { %s1369_s1 = smov 192   ;;  %s1370_s12 = smov 12  }
  0x33   :  { %62 = dma.hbm_to_vmem [thread:$0]  %s1581_s7, 3072, %s57_s15, [#allocation6], %s1369_s1, %s1369_s1, %s1370_s12  }
  0x34   :  { %1358 = dma.done.wait [#allocation3], 256  }
  0x35   :  { %1359 = vsyncadd [#allocation3], 4294967040 }
  0x36   :  { %1360 = dma.done.wait [#allocation6], 4096  }
  0x37   :  { %1361 = vsyncadd [#allocation6], 4294963200  ;;  %v1216_v0 = vld [vmem:[#allocation2] sm:$0xff]   ;;  %v1217_v1 = vld [vmem:[#allocation2 + $0x8] sm:$0xff]   ;;  %vm125_vm0 = vcmask 261120   ;;  %v89_v19 = vlaneseq }
  0x38   :  { %1123 = vmatprep.subr.bf16.mxu0 %v1216_v0  ;;  %v1218_v2 = vld [vmem:[%s1574_s0] sm:$0xff]   ;;  %v1219_v3 = vld [vmem:[%s1574_s0 + $0x8] sm:$0xff]   ;;  %v1220_v4 = vld [vmem:[%s1574_s0 + $0x10] sm:$0xff]  }
  0x39   :  { %1124 = vmatpush3.bf16.msra.mxu0 %v1216_v0  ;;  %1127 = vmatprep.mubr.msk.bf16.mxu0 %vm125_vm0, %v1218_v2  ;;  %v1222_v5 = vld [vmem:[#allocation5] sm:$0xff]   ;;  %v1223_v6 = vld [vmem:[#allocation5 + $0x8] sm:$0xff]   ;;  %v1224_v7 = vld [vmem:[#allocation5 + $0x10] sm:$0xff]   ;;  %v1500_v20 = vshrl.u32 %v89_v19, 7 }
  0x3a   :  { %1125 = vmatprep.subr.bf16.mxu0 %v1217_v1  ;;  %1135 = vmatprep.subr.bf16.mxu1 %v1222_v5  ;;  %v1221_v8 = vld [vmem:[%s1574_s0 + $0x18] sm:$0xff]   ;;  %v1225_v9 = vld [vmem:[#allocation5 + $0x18] sm:$0xff]   ;;  %v1226_v10 = vld [vmem:[#allocation5 + $0x20] sm:$0xff]  }
  0x3b   :  { %1136 = vmatpush3.bf16.msra.mxu1 %v1222_v5  ;;  %v1227_v11 = vld [vmem:[#allocation5 + $0x28] sm:$0xff]   ;;  %v1228_v12 = vld [vmem:[#allocation5 + $0x30] sm:$0xff]   ;;  %v1229_v13 = vld [vmem:[#allocation5 + $0x38] sm:$0xff]   ;;  %v1506_v23 = vsub.s32 0, %v1500_v20 }
  0x3c   :  { %1137 = vmatprep.subr.bf16.mxu1 %v1223_v6  ;;  %v1230_v14 = vld [vmem:[%s1579_s5] sm:$0xff]   ;;  %v1231_v15 = vld [vmem:[%s1579_s5 + $0x8] sm:$0xff]   ;;  %v1232_v16 = vld [vmem:[%s1579_s5 + $0x10] sm:$0xff]  }
  0x3d   :  { %1126 = vmatpush3.bf16.msra.mxu0 %v1217_v1  ;;  %v1233_v17 = vld [vmem:[%s1579_s5 + $0x18] sm:$0xff]   ;;  %v1234_v18 = vld [vmem:[%s1579_s5 + $0x20] sm:$0xff]   ;;  %v1235_v61 = vld [vmem:[%s1579_s5 + $0x28] sm:$0xff]  }
  0x3e   :  { %1159 = vmatprep.subr.bf16.mxu0 %v1230_v14  ;;  %v87_v21 = vld [vmem:[%s1576_s2] sm:$0x1]  ;;  %v1236_v62 = vld [vmem:[%s1579_s5 + $0x30] sm:$0xff]   ;;  %v1237_v63 = vld [vmem:[%s1579_s5 + $0x38] sm:$0xff]  }
  0x3f   :  { %1138 = vmatpush3.bf16.msra.mxu1 %v1223_v6  ;;  %v88_v22 = vunpack.c.l.bf16 %v87_v21  ;;  %v1238_v0 = vld [vmem:[#allocation7] ss:$12 sps:$4 sm:$0xff]   ;;  %v1240_v1 = vld [vmem:[#allocation7 + $0x4] ss:$12 sps:$4 sm:$0xff]   ;;  %v1518_v2 = vld [vmem:[#allocation7 + $0x8] ss:$12 sps:$4 sm:$0xff]  }
  0x40   :  { %1128 = vmatmul.mubr.msk.bf16.vlgmr.msra.gmra.mrb[0].mxu0 %vm125_vm0, %v1219_v3  ;;  %1139 = vmatprep.subr.bf16.mxu1 %v1224_v7  ;;  %v1244_v3 = vld [vmem:[#allocation7 + $0x1c] ss:$12 sps:$4 sm:$0xff]   ;;  %v1248_v5 = vld [vmem:[#allocation7 + $0x34] ss:$12 sps:$4 sm:$0xff]  }
  0x41   :  { %1131 = vmatprep.mubr.msk.bf16.mxu0 %vm125_vm0, %v1220_v4  ;;  %1160 = vmatpush3.bf16.msra.mxu0 %v1230_v14  ;;  %v92_v24 = vrot.slane %v88_v22, %v1506_v23  ;;  %v1242_v4 = vld [vmem:[#allocation7 + $0x18] ss:$12 sps:$4 sm:$0xff]   ;;  %v1246_v6 = vld [vmem:[#allocation7 + $0x30] ss:$12 sps:$4 sm:$0xff]  }
  0x42   :  { %1161 = vmatprep.subr.bf16.mxu0 %v1231_v15 }
  0x43   :  { %1140 = vmatpush3.bf16.msra.mxu1 %v1224_v7  ;;  %v1252_v7 = vld [vmem:[#allocation7 + $0x4c] ss:$12 sps:$4 sm:$0xff]  }
  0x44   :  { %1141 = vmatprep.subr.bf16.mxu1 %v1225_v9 }
  0x45   :  { %1162 = vmatpush3.bf16.msra.mxu0 %v1231_v15 }
  0x46   :  { %1163 = vmatprep.subr.bf16.mxu0 %v1232_v16 }
  0x47   :  { %1142 = vmatpush3.bf16.msra.mxu1 %v1225_v9  ;;  %v1256_v9 = vld [vmem:[#allocation7 + $0x64] ss:$12 sps:$4 sm:$0xff]  }
  0x48   :  { %1132 = vmatmul.mubr.msk.bf16.gmra.mrb[4].mxu0 %vm125_vm0, %v1221_v8  ;;  %1143 = vmatprep.subr.bf16.mxu1 %v1226_v10  ;;  %v1250_v8 = vld [vmem:[#allocation7 + $0x48] ss:$12 sps:$4 sm:$0xff]  }
  0x49   :  { %1164 = vmatpush3.bf16.msra.mxu0 %v1232_v16 }
  0x4a   :  { %1165 = vmatprep.subr.bf16.mxu0 %v1233_v17 }
  0x4b   :  { %1144 = vmatpush3.bf16.msra.mxu1 %v1226_v10  ;;  %v1254_v10 = vld [vmem:[#allocation7 + $0x60] ss:$12 sps:$4 sm:$0xff]  }
  0x4c   :  { %1145 = vmatprep.subr.bf16.mxu1 %v1227_v11 }
  0x4d   :  { %1166 = vmatpush3.bf16.msra.mxu0 %v1233_v17 }
  0x4e   :  { %1167 = vmatprep.subr.bf16.mxu0 %v1234_v18 }
  0x4f   :  { %1146 = vmatpush3.bf16.msra.mxu1 %v1227_v11  ;;  %v1260_v11 = vld [vmem:[#allocation7 + $0x7c] ss:$12 sps:$4 sm:$0xff]  }
  0x50   :  { %1147 = vmatprep.subr.bf16.mxu1 %v1228_v12 }
  0x51   :  { %1168 = vmatpush3.bf16.msra.mxu0 %v1234_v18 }
  0x52   :  { %1169 = vmatprep.subr.bf16.mxu0 %v1235_v61 }
  0x53   :  { %1148 = vmatpush3.bf16.msra.mxu1 %v1228_v12  ;;  %v1258_v12 = vld [vmem:[#allocation7 + $0x78] ss:$12 sps:$4 sm:$0xff]  }
  0x54   :  { %1149 = vmatprep.subr.bf16.mxu1 %v1229_v13 }
  0x55   :  { %1170 = vmatpush3.bf16.msra.mxu0 %v1235_v61  ;;  %v1265_v61 = vld [vmem:[#allocation7 + $0x98] ss:$12 sps:$4 sm:$0xff]  }
  0x56   :  { %1171 = vmatprep.subr.bf16.mxu0 %v1236_v62 }
  0x57   :  { %1150 = vmatpush3.bf16.msra.mxu1 %v1229_v13  ;;  %v247_v13 = vld [vmem:[%s1578_s4] sm:$0x1] }
  0x58   :  { %747 = vmatprep.subr.bf16.mxu1 %v1240_v1  ;;  %v248_v14 = vunpack.c.l.bf16 %v247_v13  ;;  %v1371_v1 = vmov 0  }
  0x59   :  { %1172 = vmatpush3.bf16.msra.mxu0 %v1236_v62  ;;  %v1268_v62 = vld [vmem:[#allocation7 + $0xac] ss:$12 sps:$4 sm:$0xff]  }
  0x5a   :  { %1173 = vmatprep.subr.bf16.mxu0 %v1237_v63  ;;  %v252_v15 = vrot.slane %v248_v14, %v1506_v23 }
  0x5d   :  { %1174 = vmatpush3.bf16.msra.mxu0 %v1237_v63  ;;  %v1266_v63 = vld [vmem:[#allocation7 + $0xa8] ss:$12 sps:$4 sm:$0xff]  }
  0x5e   :  { %1183 = vmatprep.subr.bf16.mxu0 %v1518_v2 }
 0x113   :  { %v1129_v25 = vpop.f32.mrb[0].mxu0 }
 0x114   :  { %v181_v26 = vadd.f32 %v1129_v25, %v92_v24  ;;  %v172_v27 = vpop.f32.mrb[1].mxu0 }
 0x115   :  { %v173_v28 = vadd.f32 %v172_v27, %v92_v24  ;;  %v1130_v29 = vpop.f32.mrb[2].mxu0 }
 0x116   :  { %v213_v30 = vmul.f32 0.2, %v181_v26  ;;  %v184_v31 = vadd.f32 %v1130_v29, %v92_v24  ;;  %v175_v32 = vpop.f32.mrb[3].mxu0  ;;  %vm205_vm1 = vcmp.ge.f32.partialorder %v181_v26, 0.0 }
 0x117   :  { %v211_v33 = vmul.f32 0.2, %v173_v28  ;;  %v176_v34 = vadd.f32 %v175_v32, %v92_v24  ;;  %vm203_vm3 = vcmp.ge.f32.partialorder %v173_v28, 0.0 }
 0x118   :  { %vm206_vm2 = vcmp.ge.f32.partialorder %v184_v31, 0.0  ;;  %v214_v35 = vmul.f32 0.2, %v184_v31  ;;  %v221_v37 = vsel %vm205_vm1, %v181_v26, %v213_v30 }
 0x119   :  { %v212_v36 = vmul.f32 0.2, %v176_v34  ;;  %vm204_vm4 = vcmp.ge.f32.partialorder %v176_v34, 0.0  ;;  %v219_v40 = vsel %vm203_vm3, %v173_v28, %v211_v33 }
 0x11a   :  { %v222_v38 = vsel %vm206_vm2, %v184_v31, %v214_v35 }
 0x11b   :  { %v1133_v39 = vpop.f32.mrb[4].mxu0  ;;  %v220_v41 = vsel %vm204_vm4, %v176_v34, %v212_v36  ;;  %v228_v42 = vpack.c.bf16 %v222_v38, %v221_v37 }
 0x11c   :  { %v197_v43 = vadd.f32 %v1133_v39, %v92_v24  ;;  %v188_v44 = vpop.f32.mrb[5].mxu0  ;;  %v227_v45 = vpack.c.bf16 %v220_v41, %v219_v40  ;;  %v1245_v41 = vld [vmem:[#allocation7 + $0x20] ss:$12 sps:$4 sm:$0xff]  }
 0x11d   :  { %v189_v46 = vadd.f32 %v188_v44, %v92_v24  ;;  %v1134_v47 = vpop.f32.mrb[6].mxu0 }
 0x11e   :  { %vm209_vm5 = vcmp.ge.f32.partialorder %v197_v43, 0.0  ;;  %v217_v48 = vmul.f32 0.2, %v197_v43  ;;  %v200_v49 = vadd.f32 %v1134_v47, %v92_v24  ;;  %v191_v50 = vpop.f32.mrb[7].mxu0  ;;  %1151 = vmatprep.mubr.bf16.mxu1 %v227_v45 }
 0x11f   :  { %vm207_vm6 = vcmp.ge.f32.partialorder %v189_v46, 0.0  ;;  %v215_v51 = vmul.f32 0.2, %v189_v46  ;;  %v192_v52 = vadd.f32 %v191_v50, %v92_v24  ;;  %1152 = vmatmul.mubr.bf16.vlgmr.msra.gmra.mrb[0].mxu1 %v228_v42 }
 0x120   :  { %vm210_vm7 = vcmp.ge.f32.partialorder %v200_v49, 0.0  ;;  %v218_v53 = vmul.f32 0.2, %v200_v49  ;;  %v225_v54 = vsel %vm209_vm5, %v197_v43, %v217_v48  ;;  %748 = vmatpush1.bf16.msra.mxu1 %v1238_v0  ;;  %v1269_v0 = vld [vmem:[#allocation7 + $0xb0] ss:$12 sps:$4 sm:$0xff]  }
 0x121   :  { %vm208_vm8 = vcmp.ge.f32.partialorder %v192_v52, 0.0  ;;  %v216_v55 = vmul.f32 0.2, %v192_v52  ;;  %v223_v56 = vsel %vm207_vm6, %v189_v46, %v215_v51  ;;  %749 = vmatprep.subr.bf16.mxu1 %v1244_v3 }
 0x122   :  { %v226_v57 = vsel %vm210_vm7, %v200_v49, %v218_v53  ;;  %v1249_v49 = vld [vmem:[#allocation7 + $0x38] ss:$12 sps:$4 sm:$0xff]  }
 0x123   :  { %v224_v58 = vsel %vm208_vm8, %v192_v52, %v216_v55  ;;  %v230_v59 = vpack.c.bf16 %v226_v57, %v225_v54  ;;  %v1257_v57 = vld [vmem:[#allocation7 + $0x68] ss:$12 sps:$4 sm:$0xff]  }
 0x124   :  { %v229_v60 = vpack.c.bf16 %v224_v58, %v223_v56  ;;  %750 = vmatpush1.bf16.msra.mxu1 %v1242_v4  ;;  %v1253_v56 = vld [vmem:[#allocation7 + $0x50] ss:$12 sps:$4 sm:$0xff]   ;;  %v1261_v58 = vld [vmem:[#allocation7 + $0x80] ss:$12 sps:$4 sm:$0xff]  }
 0x125   :  { %751 = vmatprep.subr.bf16.mxu1 %v1248_v5 }
 0x126   :  { %1155 = vmatprep.mubr.bf16.mxu1 %v229_v60  ;;  %v1262_v60 = vld [vmem:[#allocation7 + $0x90] ss:$12 sps:$4 sm:$0xff]  }
 0x127   :  { %1156 = vmatmul.mubr.bf16.gmra.mrb[4].mxu1 %v230_v59  ;;  %v1264_v59 = vld [vmem:[#allocation7 + $0x94] ss:$12 sps:$4 sm:$0xff]  }
 0x128   :  { %752 = vmatpush1.bf16.msra.mxu1 %v1246_v6  ;;  %779 = vmatprep.mubr.bf16.mxu1 %v1371_v1 }
 0x129   :  { %753 = vmatprep.subr.bf16.mxu1 %v1252_v7 }
 0x12c   :  { %754 = vmatpush1.bf16.msra.mxu1 %v1250_v8 }
 0x12d   :  { %755 = vmatprep.subr.bf16.mxu1 %v1256_v9 }
 0x130   :  { %756 = vmatpush1.bf16.msra.mxu1 %v1254_v10 }
 0x131   :  { %757 = vmatprep.subr.bf16.mxu1 %v1260_v11 }
 0x134   :  { %758 = vmatpush1.bf16.msra.mxu1 %v1258_v12 }
 0x135   :  { %759 = vmatprep.subr.bf16.mxu1 %v1264_v59 }
 0x138   :  { %760 = vmatpush1.bf16.msra.mxu1 %v1262_v60 }
 0x139   :  { %761 = vmatprep.subr.bf16.mxu1 %v1268_v62 }
 0x13c   :  { %762 = vmatpush1.bf16.msra.mxu1 %v1266_v63 }
 0x1f2   :  { %v1153_v16 = vpop.f32.mrb[0].mxu1 }
 0x1f3   :  { %v344_v17 = vadd.f32 %v1153_v16, %v252_v15  ;;  %v335_v18 = vpop.f32.mrb[1].mxu1 }
 0x1f4   :  { %v336_v19 = vadd.f32 %v335_v18, %v252_v15  ;;  %v1154_v21 = vpop.f32.mrb[2].mxu1 }
 0x1f5   :  { %v376_v22 = vmul.f32 0.01, %v344_v17  ;;  %v347_v24 = vadd.f32 %v1154_v21, %v252_v15  ;;  %v338_v25 = vpop.f32.mrb[3].mxu1  ;;  %vm368_vm9 = vcmp.ge.f32.partialorder %v344_v17, 0.0 }
 0x1f6   :  { %v374_v26 = vmul.f32 0.01, %v336_v19  ;;  %v339_v27 = vadd.f32 %v338_v25, %v252_v15  ;;  %vm366_vm10 = vcmp.ge.f32.partialorder %v336_v19, 0.0 }
 0x1f7   :  { %vm369_vm11 = vcmp.ge.f32.partialorder %v347_v24, 0.0  ;;  %v377_v28 = vmul.f32 0.01, %v347_v24  ;;  %v384_v30 = vsel %vm368_vm9, %v344_v17, %v376_v22 }
 0x1f8   :  { %vm367_vm12 = vcmp.ge.f32.partialorder %v339_v27, 0.0  ;;  %v375_v29 = vmul.f32 0.01, %v339_v27  ;;  %v382_v34 = vsel %vm366_vm10, %v336_v19, %v374_v26 }
 0x1f9   :  { %v385_v31 = vsel %vm369_vm11, %v347_v24, %v377_v28 }
 0x1fa   :  { %v391_v32 = vpack.c.bf16 %v385_v31, %v384_v30  ;;  %v1157_v33 = vpop.f32.mrb[4].mxu1  ;;  %v383_v35 = vsel %vm367_vm12, %v339_v27, %v375_v29 }
 0x1fb   :  { %v360_v36 = vadd.f32 %v1157_v33, %v252_v15  ;;  %v351_v37 = vpop.f32.mrb[5].mxu1  ;;  %v390_v38 = vpack.c.bf16 %v383_v35, %v382_v34 }
 0x1fc   :  { %v352_v39 = vadd.f32 %v351_v37, %v252_v15  ;;  %v1158_v40 = vpop.f32.mrb[6].mxu1 }
 0x1fd   :  { %v380_v42 = vmul.f32 0.01, %v360_v36  ;;  %v363_v43 = vadd.f32 %v1158_v40, %v252_v15  ;;  %v354_v44 = vpop.f32.mrb[7].mxu1  ;;  %1175 = vmatprep.mubr.bf16.mxu0 %v390_v38  ;;  %vm372_vm13 = vcmp.ge.f32.partialorder %v360_v36, 0.0 }
 0x1fe   :  { %v378_v45 = vmul.f32 0.01, %v352_v39  ;;  %v355_v46 = vadd.f32 %v354_v44, %v252_v15  ;;  %1176 = vmatmul.mubr.bf16.vlgmr.msra.gmra.mrb[8].mxu0 %v391_v32  ;;  %vm370_vm14 = vcmp.ge.f32.partialorder %v352_v39, 0.0 }
 0x1ff   :  { %vm373_vm15 = vcmp.ge.f32.partialorder %v363_v43, 0.0  ;;  %v381_v47 = vmul.f32 0.01, %v363_v43  ;;  %1184 = vmatpush3.bf16.msra.mxu0 %v1518_v2  ;;  %v388_v50 = vsel %vm372_vm13, %v360_v36, %v380_v42  ;;  %v410_v2 = vld [vmem:[%s1580_s6] sm:$0x1] }
 0x200   :  { %vm371_vm0 = vcmp.ge.f32.partialorder %v355_v46, 0.0  ;;  %v379_v48 = vmul.f32 0.01, %v355_v46  ;;  %1185 = vmatprep.subr.bf16.mxu0 %v1245_v41  ;;  %v386_v52 = vsel %vm370_vm14, %v352_v39, %v378_v45  ;;  %v411_v3 = vunpack.c.l.bf16 %v410_v2 }
 0x201   :  { %v389_v51 = vsel %vm373_vm15, %v363_v43, %v381_v47  ;;  %v589_v43 = vld [vmem:[%s1582_s8] sm:$0x7]  ;;  %v598_v45 = vsub.s32 2, %v1500_v20  ;;  %s1372_s8 = smov [#allocation8]  }
 0x202   :  { %v387_v53 = vsel %vm371_vm0, %v355_v46, %v379_v48  ;;  %v393_v54 = vpack.c.bf16 %v389_v51, %v388_v50  ;;  %v415_v4 = vrot.slane %v411_v3, %v1506_v23  ;;  %v590_v44 = vunpack.c.l.bf16 %v589_v43  ;;  %s986_s30 = sshll.u32 %s1372_s8, 4  ;;  %s987_s30 = int_to_ptr.vmem [resolvable:$true] %s986_s30 }
 0x203   :  { %v392_v55 = vpack.c.bf16 %v387_v53, %v386_v52  ;;  %1186 = vmatpush3.bf16.msra.mxu0 %v1245_v41  ;;  %v602_v46 = vsub.s32 4, %v1500_v20  ;;  %s1336_s11 = scalar_lea.vmem %s987_s30, 1536  ;;  %p1341_p11 = scmp.lt.s32.totalorder %s987_s30, %s987_s30 }
 0x204   :  { %1187 = vmatprep.subr.bf16.mxu0 %v1249_v49  ;;  %v595_v47 = vrot.slane %v590_v44, %v1506_v23  ;;  %v599_v48 = vrot.slane %v590_v44, %v598_v45  ;;  %p1337_p10 = scmp.ne.s32.totalorder %s987_s30, %s1336_s11  ;;  %p1342_p12 = scmp.lt.s32.totalorder %s1336_s11, %s1336_s11 }
 0x205   :  { %1179 = vmatprep.mubr.bf16.mxu0 %v392_v55 }
 0x206   :  { %1180 = vmatmul.mubr.bf16.gmra.mrb[12].mxu0 %v393_v54  ;;  %v1537_v50 = vrot.slane %v595_v47, %v1506_v23  ;;  %v1540_v51 = vrot.slane %v599_v48, %v1506_v23  ;;  %p1343_p13 = por %p1342_p12, %p1341_p11 }
 0x207   :  { %1188 = vmatpush3.bf16.msra.mxu0 %v1249_v49  ;;  %v603_v49 = vrot.slane %v590_v44, %v602_v46 }
 0x208   :  { %1189 = vmatprep.subr.bf16.mxu0 %v1253_v56  ;;  %p1344_p0 = pnand %p1343_p13, %p1337_p10 }
 0x209   :  { %v618_v52 = vrot.slane %v603_v49, %v1506_v23 }
 0x20b   :  { %1190 = vmatpush3.bf16.msra.mxu0 %v1253_v56 }
 0x20c   :  { %1191 = vmatprep.subr.bf16.mxu0 %v1257_v57 }
 0x20f   :  { %1192 = vmatpush3.bf16.msra.mxu0 %v1257_v57 }
 0x210   :  { %1193 = vmatprep.subr.bf16.mxu0 %v1261_v58 }
 0x213   :  { %1194 = vmatpush3.bf16.msra.mxu0 %v1261_v58 }
 0x214   :  { %1195 = vmatprep.subr.bf16.mxu0 %v1265_v61 }
 0x217   :  { %1196 = vmatpush3.bf16.msra.mxu0 %v1265_v61 }
 0x218   :  { %1197 = vmatprep.subr.bf16.mxu0 %v1269_v0 }
 0x21b   :  { %1198 = vmatpush3.bf16.msra.mxu0 %v1269_v0 }
 0x2d1   :  { %v1177_v5 = vpop.f32.mrb[8].mxu0 }
 0x2d2   :  { %v507_v6 = vadd.f32 %v1177_v5, %v415_v4  ;;  %v498_v7 = vpop.f32.mrb[9].mxu0 }
 0x2d3   :  { %v499_v8 = vadd.f32 %v498_v7, %v415_v4  ;;  %v1178_v9 = vpop.f32.mrb[10].mxu0 }
 0x2d4   :  { %v539_v10 = vmul.f32 0.01, %v507_v6  ;;  %v510_v11 = vadd.f32 %v1178_v9, %v415_v4  ;;  %v501_v12 = vpop.f32.mrb[11].mxu0  ;;  %vm531_vm1 = vcmp.ge.f32.partialorder %v507_v6, 0.0 }
 0x2d5   :  { %v537_v13 = vmul.f32 0.01, %v499_v8  ;;  %v502_v14 = vadd.f32 %v501_v12, %v415_v4  ;;  %vm529_vm2 = vcmp.ge.f32.partialorder %v499_v8, 0.0 }
 0x2d6   :  { %vm532_vm3 = vcmp.ge.f32.partialorder %v510_v11, 0.0  ;;  %v540_v15 = vmul.f32 0.01, %v510_v11  ;;  %v547_v17 = vsel %vm531_vm1, %v507_v6, %v539_v10 }
 0x2d7   :  { %vm530_vm4 = vcmp.ge.f32.partialorder %v502_v14, 0.0  ;;  %v538_v16 = vmul.f32 0.01, %v502_v14  ;;  %v545_v19 = vsel %vm529_vm2, %v499_v8, %v537_v13 }
 0x2d8   :  { %v548_v18 = vsel %vm532_vm3, %v510_v11, %v540_v15 }
 0x2d9   :  { %v554_v21 = vpack.c.bf16 %v548_v18, %v547_v17  ;;  %v546_v22 = vsel %vm530_vm4, %v502_v14, %v538_v16  ;;  %v1181_v24 = vpop.f32.mrb[12].mxu0 }
 0x2da   :  { %v553_v25 = vpack.c.bf16 %v546_v22, %v545_v19  ;;  %v523_v26 = vadd.f32 %v1181_v24, %v415_v4  ;;  %v514_v27 = vpop.f32.mrb[13].mxu0 }
 0x2db   :  { %v515_v28 = vadd.f32 %v514_v27, %v415_v4  ;;  %v1182_v29 = vpop.f32.mrb[14].mxu0 }
 0x2dc   :  { %v543_v30 = vmul.f32 0.01, %v523_v26  ;;  %v526_v31 = vadd.f32 %v1182_v29, %v415_v4  ;;  %v517_v32 = vpop.f32.mrb[15].mxu0  ;;  %780 = vmatmul.mubr.bf16.vlgmr.msra.gmra.mrb[8].mxu1 %v553_v25  ;;  %1199 = vmatprep.mubr.bf16.mxu0 %v553_v25  ;;  %vm535_vm5 = vcmp.ge.f32.partialorder %v523_v26, 0.0 }
 0x2dd   :  { %v541_v33 = vmul.f32 0.01, %v515_v28  ;;  %v518_v34 = vadd.f32 %v517_v32, %v415_v4  ;;  %1200 = vmatmul.mubr.bf16.vlgmr.msra.gmra.mrb[16].mxu0 %v554_v21  ;;  %789 = vmatprep.mubr.bf16.mxu1 %v1371_v1  ;;  %vm533_vm6 = vcmp.ge.f32.partialorder %v515_v28, 0.0 }
 0x2de   :  { %vm536_vm7 = vcmp.ge.f32.partialorder %v526_v31, 0.0  ;;  %v544_v35 = vmul.f32 0.01, %v526_v31  ;;  %v551_v37 = vsel %vm535_vm5, %v523_v26, %v543_v30 }
 0x2df   :  { %vm534_vm8 = vcmp.ge.f32.partialorder %v518_v34, 0.0  ;;  %v542_v36 = vmul.f32 0.01, %v518_v34  ;;  %v549_v39 = vsel %vm533_vm6, %v515_v28, %v541_v33 }
 0x2e0   :  { %v552_v38 = vsel %vm536_vm7, %v526_v31, %v544_v35 }
 0x2e1   :  { %v550_v40 = vsel %vm534_vm8, %v518_v34, %v542_v36  ;;  %v556_v41 = vpack.c.bf16 %v552_v38, %v551_v37 }
 0x2e2   :  { %v555_v42 = vpack.c.bf16 %v550_v40, %v549_v39 }
 0x2e4   :  { %790 = vmatmul.mubr.bf16.gmra.mrb[12].mxu1 %v554_v21  ;;  %1203 = vmatprep.mubr.bf16.mxu0 %v555_v42 }
 0x2e5   :  { %1204 = vmatmul.mubr.bf16.gmra.mrb[20].mxu0 %v556_v41  ;;  %799 = vmatprep.mubr.bf16.mxu1 %v1371_v1 }
 0x2ec   :  { %800 = vmatmul.mubr.bf16.gmra.mrb[16].mxu1 %v555_v42 }
 0x2ed   :  { %809 = vmatprep.mubr.bf16.mxu1 %v1371_v1 }
 0x2f4   :  { %810 = vmatmul.mubr.bf16.gmra.mrb[20].mxu1 %v556_v41 }
 0x3af   :  { %v781_v53 = vpop.f32.mrb[8].mxu1 }
 0x3b0   :  { %v782_v54 = vadd.f32 %v781_v53, %v1537_v50  ;;  %v783_v55 = vpop.f32.mrb[9].mxu1  ;;  %v1201_v56 = vpop.f32.mrb[16].mxu0 }
 0x3b1   :  { %v784_v57 = vadd.f32 %v783_v55, %v1540_v51  ;;  %v863_v20 = vadd.f32 %v1201_v56, %v618_v52  ;;  %v785_v58 = vpop.f32.mrb[10].mxu1  ;;  %v854_v59 = vpop.f32.mrb[17].mxu0 }
 0x3b2   :  { %v786_v60 = vadd.f32 %v785_v58, %v1537_v50  ;;  %v855_v61 = vadd.f32 %v854_v59, %v618_v52  ;;  %v787_v62 = vpop.f32.mrb[11].mxu1  ;;  %v1202_v63 = vpop.f32.mrb[18].mxu0 }
 0x3b3   :  { %v1065_v0 = vpack.c.bf16 %v784_v57, %v782_v54  ;;  %v1070_v1 = vpack.c.bf16 %v863_v20, %v863_v20  ;;  %v788_v2 = vadd.f32 %v787_v62, %v1540_v51  ;;  %v866_v23 = vadd.f32 %v1202_v63, %v618_v52  ;;  %v857_v3 = vpop.f32.mrb[19].mxu0 }
 0x3b4   :  { %v1066_v4 = vpack.c.bf16 %v855_v61, %v855_v61  ;;  %v858_v5 = vadd.f32 %v857_v3, %v618_v52 }
 0x3b5   :  { %965 = vst [vmem:[#allocation8] sm:$0xff] %v1065_v0  ;;  %970 = vst [vmem:[#allocation8 + $0x20] sm:$0xf] %v1070_v1  ;;  %v1067_v6 = vpack.c.bf16 %v788_v2, %v786_v60  ;;  %v1072_v7 = vpack.c.bf16 %v866_v23, %v866_v23 }
 0x3b6   :  { %966 = vst [vmem:[#allocation8 + $0x8] sm:$0xf] %v1066_v4  ;;  %v1068_v8 = vpack.c.bf16 %v858_v5, %v858_v5 }
 0x3b7   :  { %967 = vst [vmem:[#allocation8 + $0xc] sm:$0xff] %v1067_v6  ;;  %972 = vst [vmem:[#allocation8 + $0x2c] sm:$0xf] %v1072_v7  ;;  %v791_v9 = vpop.f32.mrb[12].mxu1 }
 0x3b8   :  { %968 = vst [vmem:[#allocation8 + $0x14] sm:$0xf] %v1068_v8  ;;  %v792_v10 = vadd.f32 %v791_v9, %v1537_v50  ;;  %v793_v11 = vpop.f32.mrb[13].mxu1  ;;  %v1205_v12 = vpop.f32.mrb[20].mxu0 }
 0x3b9   :  { %v794_v13 = vadd.f32 %v793_v11, %v1540_v51  ;;  %v879_v14 = vadd.f32 %v1205_v12, %v618_v52  ;;  %v795_v15 = vpop.f32.mrb[14].mxu1  ;;  %v870_v16 = vpop.f32.mrb[21].mxu0 }
 0x3ba   :  { %v796_v17 = vadd.f32 %v795_v15, %v1537_v50  ;;  %v871_v18 = vadd.f32 %v870_v16, %v618_v52  ;;  %v797_v19 = vpop.f32.mrb[15].mxu1  ;;  %v1206_v21 = vpop.f32.mrb[22].mxu0 }
 0x3bb   :  { %v1069_v22 = vpack.c.bf16 %v794_v13, %v792_v10  ;;  %v1078_v24 = vpack.c.bf16 %v879_v14, %v879_v14  ;;  %v798_v25 = vadd.f32 %v797_v19, %v1540_v51  ;;  %v882_v26 = vadd.f32 %v1206_v21, %v618_v52  ;;  %v873_v27 = vpop.f32.mrb[23].mxu0 }
 0x3bc   :  { %v1074_v28 = vpack.c.bf16 %v871_v18, %v871_v18  ;;  %v874_v29 = vadd.f32 %v873_v27, %v618_v52 }
 0x3bd   :  { %969 = vst [vmem:[#allocation8 + $0x18] sm:$0xff] %v1069_v22  ;;  %978 = vst [vmem:[#allocation8 + $0x50] sm:$0xf] %v1078_v24  ;;  %v1071_v30 = vpack.c.bf16 %v798_v25, %v796_v17  ;;  %v1080_v31 = vpack.c.bf16 %v882_v26, %v882_v26 }
 0x3be   :  { %974 = vst [vmem:[#allocation8 + $0x38] sm:$0xf] %v1074_v28  ;;  %v1076_v32 = vpack.c.bf16 %v874_v29, %v874_v29 }
 0x3bf   :  { %971 = vst [vmem:[#allocation8 + $0x24] sm:$0xff] %v1071_v30  ;;  %980 = vst [vmem:[#allocation8 + $0x5c] sm:$0xf] %v1080_v31  ;;  %v801_v33 = vpop.f32.mrb[16].mxu1 }
 0x3c0   :  { %976 = vst [vmem:[#allocation8 + $0x44] sm:$0xf] %v1076_v32  ;;  %v802_v34 = vadd.f32 %v801_v33, %v1537_v50  ;;  %v803_v35 = vpop.f32.mrb[17].mxu1 }
 0x3c1   :  { %v804_v36 = vadd.f32 %v803_v35, %v1540_v51  ;;  %v805_v37 = vpop.f32.mrb[18].mxu1 }
 0x3c2   :  { %v806_v38 = vadd.f32 %v805_v37, %v1537_v50  ;;  %v807_v39 = vpop.f32.mrb[19].mxu1 }
 0x3c3   :  { %v1073_v40 = vpack.c.bf16 %v804_v36, %v802_v34  ;;  %v808_v41 = vadd.f32 %v807_v39, %v1540_v51 }
 0x3c5   :  { %973 = vst [vmem:[#allocation8 + $0x30] sm:$0xff] %v1073_v40  ;;  %v1075_v42 = vpack.c.bf16 %v808_v41, %v806_v38 }
 0x3c7   :  { %975 = vst [vmem:[#allocation8 + $0x3c] sm:$0xff] %v1075_v42  ;;  %v811_v43 = vpop.f32.mrb[20].mxu1 }
 0x3c8   :  { %v812_v44 = vadd.f32 %v811_v43, %v1537_v50  ;;  %v813_v45 = vpop.f32.mrb[21].mxu1 }
 0x3c9   :  { %v814_v46 = vadd.f32 %v813_v45, %v1540_v51  ;;  %v815_v47 = vpop.f32.mrb[22].mxu1 }
 0x3ca   :  { %v816_v48 = vadd.f32 %v815_v47, %v1537_v50  ;;  %v817_v49 = vpop.f32.mrb[23].mxu1 }
 0x3cb   :  { %v1077_v52 = vpack.c.bf16 %v814_v46, %v812_v44  ;;  %v818_v53 = vadd.f32 %v817_v49, %v1540_v51 }
 0x3cd   :  { %977 = vst [vmem:[#allocation8 + $0x48] sm:$0xff] %v1077_v52  ;;  %v1079_v54 = vpack.c.bf16 %v818_v53, %v816_v48 }
 0x3cf   :  { %979 = vst [vmem:[#allocation8 + $0x54] sm:$0xff] %v1079_v54 }
 0x3d0   :  { %1347 = shalt.err (!%p1344_p0)
}
 0x3d1   :  { %s1348_s3 = scalar_lea.hbm %s1583_s9, 1536 }
 0x3d2   :  { %p1349_p1 = scmp.ne.s32.totalorder %s1583_s9, %s1348_s3  ;;  %p1352_p2 = scmp.lt.u32.totalorder %s1348_s3, %s1583_s9 }
 0x3d4   :  { %p1354_p3 = pnand %p1352_p2, %p1349_p1 }
 0x3d6   :  { %1357 = shalt.err (!%p1354_p3)
}
 0x3d7   :  { %992 = dma.vmem_to_hbm [thread:$0]  %s987_s30, 1536, %s1583_s9, [#allocation4], %s1369_s1, %s1369_s1, %s1370_s12  }
 0x3d8   :  { %1362 = dma.done.wait [#allocation4], 1536  }
 0x3d9   :  { %1363 = vsyncadd [#allocation4], 4294965760 }
 0x3da   :  { %996 = vsyncpa [#allocation3], 1 }
 0x3db   :  { %997 = vsyncpa [#allocation6], 1 }
 0x3dc   :  { %998 = vsyncpa [#allocation4], 1 }

</bundles_post_ra>
